<compile_context>
chip_gen: v7x
topology: tpu7x:2x2x1
jax: 0.10.0
libtpu: 0.0.40
codegen_flags: <defaults>
</compile_context>

<pallas_src>
import jax
import jax.numpy as jnp
from jax import lax
from jax.experimental import pallas as pl
from jax.experimental.pallas import tpu as pltpu


def ds_cnn_fused_kernel(x_ref, m_ref, b_ref, out_ref):
    """Fused depthwise(3x3)+pointwise(1x1) conv: one MXU matmul + bias.

    x_ref  : (rows_blk, Kp)   bf16 im2col activation rows (rows = b*H + h)
    m_ref  : (Kp, W*Cout)     bf16 fused banded weights (K = 3 H-taps stacked)
    b_ref  : (1, W*Cout)      f32 fused bias, tiled across W
    out_ref: (rows_blk, W*Cout) f32 lane-dense output rows
    """
    acc = jnp.dot(x_ref[...], m_ref[...], preferred_element_type=jnp.float32)
    out_ref[...] = (acc + b_ref[...]).astype(out_ref.dtype)


def _fuse_weights(dw_w, dw_b, pw_w, pw_b, W):
    """Fold depthwise(3x3)+pointwise(1x1) into 3 banded (W*Cin, W*Cout) matrices + bias.

    M[kh, w'*Cin+ci, w*Cout+co] = dw_w[ci,0,kh,w'-w+1] * pw_w[co,ci]  if |w'-w| <= 1
                                  0                                    otherwise
    (zero-padding along W is absorbed by the band structure).
    """
    Cin = dw_w.shape[0]
    Cout = pw_w.shape[0]
    dw = dw_w[:, 0, :, :].astype(jnp.float32)                 # (Cin, 3, 3) = [ci, kh, kw]
    pw = pw_w[:, :, 0, 0].astype(jnp.float32)                 # (Cout, Cin)
    wf = jnp.einsum('ckl,oc->klco', dw, pw)                   # (3, 3, Cin, Cout)

    diff = jnp.arange(W)[:, None] - jnp.arange(W)[None, :] + 1          # (W, W)
    valid = ((diff >= 0) & (diff <= 2)).astype(jnp.float32)
    blocks = wf[:, jnp.clip(diff, 0, 2)]                                # (3, W, W, Cin, Cout)
    blocks = blocks * valid[None, :, :, None, None]
    m = blocks.transpose(0, 1, 3, 2, 4).reshape(3, W * Cin, W * Cout)

    bf = pw @ dw_b.astype(jnp.float32) + pw_b.astype(jnp.float32)       # (Cout,)
    b_row = jnp.tile(bf, W).reshape(1, W * Cout)
    return m, b_row


def _num_tensorcores():
    """Best-effort TensorCore-per-chip count (v5e/v6e = 1, v7x = 2)."""
    try:
        info = pltpu.get_tpu_info()
        for attr in ("num_cores", "tensorcore_count", "num_tensorcores",
                     "cores_per_chip"):
            v = getattr(info, attr, None)
            if isinstance(v, int) and v > 0:
                return v
    except Exception:
        pass
    try:
        kind = jax.devices()[0].device_kind.lower()
        if "v7" in kind:
            return 2
    except Exception:
        pass
    return 1


def ds_cnn_pallas(x_nchw, dw_w, dw_b, pw_w, pw_b):
    """x_nchw: (B,Cin,H,W); dw_w: (Cin,1,3,3); dw_b: (Cin,);
       pw_w: (Cout,Cin,1,1); pw_b: (Cout,). Returns (B,Cout,H,W) float32."""
    B, Cin, H, W = x_nchw.shape
    Cout = pw_w.shape[0]
    K = 3 * W * Cin
    N = W * Cout
    Kp = ((K + 127) // 128) * 128        # pad K -> full lane vregs / MXU tiles

    # Generation-aware grid: 1 step on single-TC chips; 2-way parallel split
    # only on v7x and only if per-core work beats the per-step overhead.
    n_tc = _num_tensorcores()
    flops_exec_total = 2 * B * H * Kp * N
    if n_tc >= 2 and B >= 2 and (flops_exec_total // n_tc) >= (2 << 20):
        n_steps = n_tc
    else:
        n_steps = 1
    B_pad = ((B + n_steps - 1) // n_steps) * n_steps   # zero-pad odd B instead
                                                       # of 1-batch grid steps

    # Layout prep (one fused XLA pass around the custom call):
    # NCHW -> NHWC -> (B, H, W*Cin) slab -> H-axis im2col -> (B*H, Kp) bf16 rows.
    x_slab = jnp.transpose(x_nchw, (0, 2, 3, 1)).astype(jnp.float32)
    x_slab = x_slab.reshape(B, H, W * Cin)
    if B_pad != B:
        x_slab = jnp.pad(x_slab, ((0, B_pad - B), (0, 0), (0, 0)))
    x_hpad = jnp.pad(x_slab, ((0, 0), (1, 1), (0, 0)))              # (B, H+2, W*Cin)
    x_im2col = jnp.concatenate(
        [x_hpad[:, 0:H, :], x_hpad[:, 1:H + 1, :], x_hpad[:, 2:H + 2, :]],
        axis=-1)                                                     # (B, H, 3*W*Cin)
    if Kp != K:
        x_im2col = jnp.pad(x_im2col, ((0, 0), (0, 0), (0, Kp - K)))
    x_rows = x_im2col.reshape(B_pad * H, Kp).astype(jnp.bfloat16)

    m3, b_row = _fuse_weights(dw_w, dw_b, pw_w, pw_b, W)
    m = m3.reshape(K, N)
    if Kp != K:
        m = jnp.pad(m, ((0, Kp - K), (0, 0)))
    m = m.astype(jnp.bfloat16)                                       # (Kp, N)

    rows_blk = (B_pad // n_steps) * H

    cost = pl.CostEstimate(
        flops=2 * B_pad * H * Kp * N,            # executed (banded) MXU FLOPs
        transcendentals=0,
        bytes_accessed=2 * (B_pad * H * Kp + Kp * N) + 4 * (B_pad * H * N + N),
    )

    out_rows = pl.pallas_call(
        ds_cnn_fused_kernel,
        out_shape=jax.ShapeDtypeStruct((B_pad * H, N), jnp.float32),
        grid_spec=pltpu.PrefetchScalarGridSpec(
            num_scalar_prefetch=0,
            grid=(n_steps,),
            in_specs=[
                pl.BlockSpec((rows_blk, Kp), lambda i: (i, 0)),
                pl.BlockSpec((Kp, N), lambda i: (0, 0)),
                pl.BlockSpec((1, N), lambda i: (0, 0)),
            ],
            out_specs=pl.BlockSpec((rows_blk, N), lambda i: (i, 0)),
        ),
        compiler_params=pltpu.CompilerParams(
            dimension_semantics=("parallel",)),
        cost_estimate=cost,
    )(x_rows, m, b_row)

    # Free reshape + single transpose back to PyTorch NCHW; drop batch padding.
    out = out_rows.reshape(B_pad, H, W, Cout)[:B]
    return jnp.transpose(out, (0, 3, 1, 2))


def ds_cnn_ref(x_nchw, dw_w, dw_b, pw_w, pw_b):
    """Pure-JAX reference matching the PyTorch DS_CNN forward exactly (f32)."""
    Cin = x_nchw.shape[1]
    depth = lax.conv_general_dilated(
        x_nchw, dw_w, window_strides=(1, 1), padding="SAME",
        dimension_numbers=("NCHW", "OIHW", "NCHW"),
        feature_group_count=Cin) + dw_b[None, :, None, None]
    point = lax.conv_general_dilated(
        depth, pw_w, window_strides=(1, 1), padding="VALID",
        dimension_numbers=("NCHW", "OIHW", "NCHW")) + pw_b[None, :, None, None]
    return point


if __name__ == "__main__":
    # TODO(synk): only the DS_CNN block is kernelized here; the rest of KWS_Net
    # (1x5 convs, BatchNorm, LSTM encoder with packed sequences, 2-D CNN tail,
    # FC head) stays in plain JAX/XLA.
    B, Cin, Cout, H, W = 2, 4, 8, 16, 16          # W*Cout = 128 -> lane-dense output
    key = jax.random.PRNGKey(0)
    kx, k1, k2, k3, k4 = jax.random.split(key, 5)
    x = jax.random.normal(kx, (B, Cin, H, W), jnp.float32)
    dw_w = jax.random.normal(k1, (Cin, 1, 3, 3), jnp.float32) * 0.1
    dw_b = jax.random.normal(k2, (Cin,), jnp.float32) * 0.1
    pw_w = jax.random.normal(k3, (Cout, Cin, 1, 1), jnp.float32) * 0.1
    pw_b = jax.random.normal(k4, (Cout,), jnp.float32) * 0.1

    out = jax.block_until_ready(ds_cnn_pallas(x, dw_w, dw_b, pw_w, pw_b))
    ref = ds_cnn_ref(x, dw_w, dw_b, pw_w, pw_b)
    assert out.shape == (B, Cout, H, W)
    # bf16 MXU inputs with f32 accumulate -> tolerance loosened vs the f32 run.
    assert jnp.allclose(out, ref, atol=1e-2, rtol=1e-2), "mismatch vs JAX reference"
    print("KERNEL_OK")
</pallas_src>

<mosaic_0001>
module attributes {stable_mosaic.version = 11 : i64} {
  func.func @ds_cnn_fused_kernel(%arg0: i32, %arg1: memref<32x256xbf16, #tpu.memory_space<vmem>>, %arg2: memref<256x128xbf16, #tpu.memory_space<vmem>>, %arg3: memref<1x128xf32, #tpu.memory_space<vmem>>, %arg4: memref<32x128xf32, #tpu.memory_space<vmem>>) attributes {dimension_semantics = [#tpu.dimension_semantics<parallel>], iteration_bounds = array<i64: 1>, scalar_prefetch = 0 : i64, scratch_operands = 0 : i64, tpu.core_type = #tpu.core_type<tc>, window_params = [{transform_indices = @transform_0, window_bounds = array<i64: 32, 256>}, {pipeline_mode = #tpu.pipeline_mode<synchronous>, transform_indices = @transform_1, window_bounds = array<i64: 256, 128>}, {pipeline_mode = #tpu.pipeline_mode<synchronous>, transform_indices = @transform_2, window_bounds = array<i64: 1, 128>}, {transform_indices = @transform_3, window_bounds = array<i64: 32, 128>}]} {
    %c0 = arith.constant 0 : index
    %c0_0 = arith.constant 0 : index
    %0 = vector.load %arg1[%c0, %c0_0] : memref<32x256xbf16, #tpu.memory_space<vmem>>, vector<32x256xbf16>
    %c0_1 = arith.constant 0 : index
    %c0_2 = arith.constant 0 : index
    %1 = vector.load %arg2[%c0_1, %c0_2] : memref<256x128xbf16, #tpu.memory_space<vmem>>, vector<256x128xbf16>
    %cst = arith.constant dense<0.000000e+00> : vector<32x128xf32>
    %2 = tpu.matmul %0, %1, %cst {dimension_numbers = #tpu.dot_dimension_numbers<[1], [0], [0], [1], [0, 0, 1, 1], [], []>} : vector<32x256xbf16>, vector<256x128xbf16>, vector<32x128xf32> -> vector<32x128xf32>
    %c0_3 = arith.constant 0 : index
    %c0_4 = arith.constant 0 : index
    %3 = vector.load %arg3[%c0_3, %c0_4] : memref<1x128xf32, #tpu.memory_space<vmem>>, vector<1x128xf32>
    %4 = vector.broadcast %3 : vector<1x128xf32> to vector<32x128xf32>
    %5 = arith.addf %2, %4 : vector<32x128xf32>
    %c0_5 = arith.constant 0 : index
    %c0_6 = arith.constant 0 : index
    %6 = vector.load %arg4[%c0_5, %c0_6] : memref<32x128xf32, #tpu.memory_space<vmem>>, vector<32x128xf32>
    tpu.vector_store %arg4[%c0_5, %c0_6], %5 {strides = array<i32>} : memref<32x128xf32, #tpu.memory_space<vmem>>, vector<32x128xf32>,
    return
  }
  func.func @transform_0(%arg0: i32) -> (i32, i32) {
    %c0_i32 = arith.constant 0 : i32
    %c0_i32_0 = arith.constant 0 : i32
    return %arg0, %c0_i32 : i32, i32
  }
  func.func @transform_1(%arg0: i32) -> (i32, i32) {
    %c0_i32 = arith.constant 0 : i32
    %c0_i32_0 = arith.constant 0 : i32
    %c0_i32_1 = arith.constant 0 : i32
    return %c0_i32, %c0_i32_0 : i32, i32
  }
  func.func @transform_2(%arg0: i32) -> (i32, i32) {
    %c0_i32 = arith.constant 0 : i32
    %c0_i32_0 = arith.constant 0 : i32
    %c0_i32_1 = arith.constant 0 : i32
    return %c0_i32, %c0_i32_0 : i32, i32
  }
  func.func @transform_3(%arg0: i32) -> (i32, i32) {
    %c0_i32 = arith.constant 0 : i32
    %c0_i32_0 = arith.constant 0 : i32
    return %arg0, %c0_i32 : i32, i32
  }
}

</mosaic_0001>

<bundles_post_ra>
// kernel: tpu_custom_call.1
= control target key start
LH: loop header
LB: loop body
LE: loop exit
PB: predicated region body
PF: predicated region fallthrough
CT: control target
= control target key end

     0   :  { %8 = vsyncpa [#allocation3], 0  ;;  %s512_s0 = inlined_call_operand.hbm [shape: bf16[32,256], index: 0, kind: input, shape index: {}]   ;;  %s513_s1 = inlined_call_operand.hbm [shape: bf16[256,128], index: 1, kind: input, shape index: {}]   ;;  %s514_s2 = inlined_call_operand.vmem [shape: f32[1,128], index: 2, kind: input, shape index: {}]   ;;  %s515_s3 = inlined_call_operand.hbm [shape: f32[32,128], index: 3, kind: output, shape index: {}]  }
   0x1   :  { %9 = vsyncpa [#allocation6], 0 }
   0x2   :  { %10 = vsyncpa [#allocation4], 0  ;;  %s440_s12 = smov [#allocation2]   ;;  %s368_s16 = scalar_lea.hbm %s512_s0, 512 }
   0x3   :  { %s16_s13 = sshll.u32 %s440_s12, 4  ;;  %p369_p0 = scmp.ne.s32.totalorder %s512_s0, %s368_s16  ;;  %s17_s13 = int_to_ptr.vmem [resolvable:$true] %s16_s13 }
   0x4   :  { %p372_p1 = scmp.lt.u32.totalorder %s368_s16, %s512_s0 }
   0x6   :  { %p374_p2 = pnand %p372_p1, %p369_p0 }
   0x8   :  { %377 = shalt.err (!%p374_p2)
}
   0x9   :  { %s378_s21 = scalar_lea.vmem %s17_s13, 512  ;;  %p383_p4 = scmp.lt.s32.totalorder %s17_s13, %s17_s13 }
   0xa   :  { %p379_p3 = scmp.ne.s32.totalorder %s17_s13, %s378_s21  ;;  %p384_p5 = scmp.lt.s32.totalorder %s378_s21, %s378_s21 }
   0xc   :  { %p385_p6 = por %p384_p5, %p383_p4 }
   0xe   :  { %p386_p7 = pnand %p385_p6, %p379_p3 }
  0x10   :  { %389 = shalt.err (!%p386_p7)
}
  0x11   :  { %s441_s22 = smov 128   ;;  %s442_s23 = smov 8  }
  0x12   :  { %22 = dma.hbm_to_vmem [thread:$0]  %s512_s0, 512, %s17_s13, [#allocation3], %s441_s22, %s441_s22, %s442_s23  }
  0x13   :  { %s443_s26 = smov [#allocation5]   ;;  %s390_s30 = scalar_lea.hbm %s513_s1, 2048 }
  0x14   :  { %s28_s27 = sshll.u32 %s443_s26, 4  ;;  %p391_p8 = scmp.ne.s32.totalorder %s513_s1, %s390_s30  ;;  %s29_s27 = int_to_ptr.vmem [resolvable:$true] %s28_s27 }
  0x15   :  { %p394_p9 = scmp.lt.u32.totalorder %s390_s30, %s513_s1 }
  0x17   :  { %p396_p10 = pnand %p394_p9, %p391_p8 }
  0x19   :  { %399 = shalt.err (!%p396_p10)
}
  0x1a   :  { %s400_s8 = scalar_lea.vmem %s29_s27, 2048  ;;  %p405_p12 = scmp.lt.s32.totalorder %s29_s27, %s29_s27 }
  0x1b   :  { %p401_p11 = scmp.ne.s32.totalorder %s29_s27, %s400_s8  ;;  %p406_p13 = scmp.lt.s32.totalorder %s400_s8, %s400_s8 }
  0x1d   :  { %p407_p0 = por %p406_p13, %p405_p12 }
  0x1f   :  { %p408_p1 = pnand %p407_p0, %p401_p11 }
  0x21   :  { %411 = shalt.err (!%p408_p1)
}
  0x22   :  { %s444_s0 = smov 64   ;;  %s445_s9 = smov 4  }
  0x23   :  { %34 = dma.hbm_to_vmem [thread:$0]  %s513_s1, 2048, %s29_s27, [#allocation6], %s444_s0, %s444_s0, %s445_s9  }
  0x24   :  { %434 = dma.done.wait [#allocation3], 512  }
  0x25   :  { %435 = vsyncadd [#allocation3], 4294966784 }
  0x26   :  { %436 = dma.done.wait [#allocation6], 2048  }
  0x27   :  { %437 = vsyncadd [#allocation6], 4294965248  ;;  %v346_v0 = vld [vmem:[#allocation5 + $0x40] sm:$0xff]   ;;  %v348_v2 = vld [vmem:[#allocation5 + $0x48] sm:$0xff]   ;;  %s446_s13 = smov [#allocation7]  }
  0x28   :  { %v347_v1 = vld [vmem:[#allocation5] sm:$0xff]   ;;  %295 = vmatprep.subr.bf16.mxu0 %v346_v0  ;;  %323 = vmatprep.subr.bf16.mxu1 %v346_v0  ;;  %v349_v3 = vld [vmem:[#allocation5 + $0x8] sm:$0xff]   ;;  %v350_v4 = vld [vmem:[#allocation5 + $0x50] sm:$0xff]   ;;  %s261_s14 = sshll.u32 %s446_s13, 4  ;;  %s262_s14 = int_to_ptr.vmem [resolvable:$true] %s261_s14 }
  0x29   :  { %296 = vmatpush3.bf16.msra.mxu0 %v347_v1  ;;  %331 = vmatpush3.bf16.msra.mxu1 %v347_v1  ;;  %v351_v5 = vld [vmem:[#allocation5 + $0x10] sm:$0xff]   ;;  %v352_v6 = vld [vmem:[#allocation5 + $0x58] sm:$0xff]   ;;  %v354_v8 = vld [vmem:[#allocation5 + $0x60] sm:$0xff]   ;;  %p417_p3 = scmp.lt.s32.totalorder %s262_s14, %s262_s14 }
  0x2a   :  { %297 = vmatprep.subr.bf16.mxu0 %v348_v2  ;;  %324 = vmatprep.subr.bf16.mxu1 %v348_v2  ;;  %v353_v7 = vld [vmem:[#allocation5 + $0x18] sm:$0xff]   ;;  %v355_v9 = vld [vmem:[#allocation5 + $0x20] sm:$0xff]   ;;  %v356_v10 = vld [vmem:[#allocation5 + $0x68] sm:$0xff]  }
  0x2b   :  { %v364_v11 = vld [vmem:[#allocation2 + $0x4] ss:$8 sps:$4 sm:$0xff]   ;;  %v367_v12 = vld [vmem:[#allocation2 + $0x14] ss:$8 sps:$4 sm:$0xff]   ;;  %v362_v18 = vld [vmem:[#allocation2] ss:$8 sps:$4 sm:$0xff]  }
  0x2c   :  { %v357_v13 = vld [vmem:[#allocation5 + $0x28] sm:$0xff]   ;;  %v358_v14 = vld [vmem:[#allocation5 + $0x70] sm:$0xff]   ;;  %235 = vmatprep.mubr.bf16.mxu0 %v364_v11  ;;  %243 = vmatprep.mubr.bf16.mxu1 %v367_v12  ;;  %v360_v16 = vld [vmem:[#allocation5 + $0x78] sm:$0xff]  }
  0x2d   :  { %298 = vmatpush3.bf16.msra.mxu0 %v349_v3  ;;  %332 = vmatpush3.bf16.msra.mxu1 %v349_v3  ;;  %v359_v15 = vld [vmem:[#allocation5 + $0x30] sm:$0xff]   ;;  %v361_v17 = vld [vmem:[#allocation5 + $0x38] sm:$0xff]   ;;  %v274_v22 = vld [vmem:[%s514_s2] ss:$0 sm:$0xff]  ;;  %s412_s2 = scalar_lea.vmem %s262_s14, 512 }
  0x2e   :  { %299 = vmatprep.subr.bf16.mxu0 %v350_v4  ;;  %325 = vmatprep.subr.bf16.mxu1 %v350_v4  ;;  %v365_v19 = vld [vmem:[#allocation2 + $0x10] ss:$8 sps:$4 sm:$0xff]   ;;  %p413_p2 = scmp.ne.s32.totalorder %s262_s14, %s412_s2  ;;  %p418_p4 = scmp.lt.s32.totalorder %s412_s2, %s412_s2 }
  0x30   :  { %p419_p5 = por %p418_p4, %p417_p3 }
  0x31   :  { %300 = vmatpush3.bf16.msra.mxu0 %v351_v5  ;;  %333 = vmatpush3.bf16.msra.mxu1 %v351_v5 }
  0x32   :  { %301 = vmatprep.subr.bf16.mxu0 %v352_v6  ;;  %326 = vmatprep.subr.bf16.mxu1 %v352_v6  ;;  %p420_p6 = pnand %p419_p5, %p413_p2 }
  0x35   :  { %302 = vmatpush3.bf16.msra.mxu0 %v353_v7  ;;  %334 = vmatpush3.bf16.msra.mxu1 %v353_v7 }
  0x36   :  { %303 = vmatprep.subr.bf16.mxu0 %v354_v8  ;;  %327 = vmatprep.subr.bf16.mxu1 %v354_v8 }
  0x39   :  { %304 = vmatpush3.bf16.msra.mxu0 %v355_v9  ;;  %335 = vmatpush3.bf16.msra.mxu1 %v355_v9 }
  0x3a   :  { %305 = vmatprep.subr.bf16.mxu0 %v356_v10  ;;  %328 = vmatprep.subr.bf16.mxu1 %v356_v10 }
  0x3d   :  { %306 = vmatpush3.bf16.msra.mxu0 %v357_v13  ;;  %336 = vmatpush3.bf16.msra.mxu1 %v357_v13 }
  0x3e   :  { %307 = vmatprep.subr.bf16.mxu0 %v358_v14  ;;  %329 = vmatprep.subr.bf16.mxu1 %v358_v14 }
  0x41   :  { %308 = vmatpush3.bf16.msra.mxu0 %v359_v15  ;;  %337 = vmatpush3.bf16.msra.mxu1 %v359_v15 }
  0x42   :  { %309 = vmatprep.subr.bf16.mxu0 %v360_v16  ;;  %330 = vmatprep.subr.bf16.mxu1 %v360_v16 }
  0x45   :  { %310 = vmatpush3.bf16.msra.mxu0 %v361_v17  ;;  %338 = vmatpush3.bf16.msra.mxu1 %v361_v17 }
  0x48   :  { %236 = vmatmul.mubr.bf16.vlgmr.msra.gmra.mrb[0].mxu0 %v362_v18  ;;  %244 = vmatmul.mubr.bf16.vlgmr.msra.gmra.mrb[0].mxu1 %v365_v19 }
 0x11b   :  { %v311_v20 = vpop.f32.mrb[0].mxu0  ;;  %v317_v21 = vpop.f32.mrb[0].mxu1 }
 0x11c   :  { %v312_v23 = vpop.f32.mrb[1].mxu0  ;;  %v318_v24 = vpop.f32.mrb[1].mxu1 }
 0x11d   :  { %v313_v25 = vadd.f32 %v312_v23, %v311_v20  ;;  %v319_v26 = vadd.f32 %v318_v24, %v317_v21  ;;  %v314_v27 = vpop.f32.mrb[2].mxu0  ;;  %v320_v28 = vpop.f32.mrb[2].mxu1 }
 0x11e   :  { %v315_v29 = vpop.f32.mrb[3].mxu0  ;;  %v321_v30 = vpop.f32.mrb[3].mxu1 }
 0x11f   :  { %v238_v31 = vadd.f32 %v313_v25, %v274_v22  ;;  %v246_v32 = vadd.f32 %v319_v26, %v274_v22  ;;  %v316_v33 = vadd.f32 %v315_v29, %v314_v27  ;;  %v322_v34 = vadd.f32 %v321_v30, %v320_v28 }
 0x121   :  { %252 = vst [vmem:[#allocation7] sm:$0xff] %v238_v31  ;;  %254 = vst [vmem:[#allocation7 + $0x10] sm:$0xff] %v246_v32  ;;  %v241_v35 = vadd.f32 %v316_v33, %v274_v22  ;;  %v249_v36 = vadd.f32 %v322_v34, %v274_v22 }
 0x123   :  { %253 = vst [vmem:[#allocation7 + $0x8] sm:$0xff] %v241_v35  ;;  %255 = vst [vmem:[#allocation7 + $0x18] sm:$0xff] %v249_v36 }
 0x124   :  { %423 = shalt.err (!%p420_p6)
}
 0x125   :  { %s424_s17 = scalar_lea.hbm %s515_s3, 512 }
 0x126   :  { %p425_p7 = scmp.ne.s32.totalorder %s515_s3, %s424_s17  ;;  %p428_p8 = scmp.lt.u32.totalorder %s424_s17, %s515_s3 }
 0x128   :  { %p430_p9 = pnand %p428_p8, %p425_p7 }
 0x12a   :  { %433 = shalt.err (!%p430_p9)
}
 0x12b   :  { %267 = dma.vmem_to_hbm [thread:$0]  %s262_s14, 512, %s515_s3, [#allocation4], %s441_s22, %s441_s22, %s442_s23  }
 0x12c   :  { %438 = dma.done.wait [#allocation4], 512  }
 0x12d   :  { %439 = vsyncadd [#allocation4], 4294966784 }
 0x12e   :  { %271 = vsyncpa [#allocation3], 1 }
 0x12f   :  { %272 = vsyncpa [#allocation6], 1 }
 0x130   :  { %273 = vsyncpa [#allocation4], 1 }

</bundles_post_ra>
